<compile_context>
chip_gen: v5e
topology: v5e:2x2
jax: 0.10.0
libtpu: 0.0.40
codegen_flags: <defaults>
</compile_context>

<pallas_src>
import math

import jax
import jax.numpy as jnp
from jax.experimental import pallas as pl
from jax.experimental.pallas import tpu as pltpu

LANE = 128      # TPU lane width  (last-dim alignment)
SUBLANE = 8     # TPU sublane width (second-to-last-dim alignment)


def _round_up(x, m):
    return ((x + m - 1) // m) * m


def _pad2d(a, rows, cols, fill=0.0):
    r, c = a.shape
    return jnp.pad(a, ((0, rows - r), (0, cols - c)), constant_values=fill)


# ----------------------------------------------------------------------------
# Fused network kernel
#   with_head=False : x -> [dense+tanh]*L -> hidden
#   with_head=True  : x -> [dense+tanh]*L -> dense -> (logits, probs+entropy)
# All matmuls hit the MXU with bf16 operands / f32 accumulation; activations
# live in vregs/VMEM for the whole tile, never round-tripping through HBM.
# ----------------------------------------------------------------------------
def _make_network_kernel(num_layers, with_head, ent_lane):
    def kernel(*refs):
        h = refs[0][...]                                   # (TILE_M, K0) f32
        idx = 1
        for _ in range(num_layers):
            w_ref, b_ref = refs[idx], refs[idx + 1]        # bf16 weights, f32 bias
            idx += 2
            z = jnp.dot(h.astype(jnp.bfloat16), w_ref[...],
                        preferred_element_type=jnp.float32) + b_ref[...]
            h = jnp.tanh(z)

        if not with_head:
            refs[idx][...] = h                             # hidden output
            return

        ow_ref, ob_ref = refs[idx], refs[idx + 1]
        logits_ref = refs[idx + 2]
        pe_ref = refs[idx + 3]                             # probs + entropy slab

        # logits (padded classes carry a -1e30 bias -> exp underflows to 0)
        logits = (jnp.dot(h.astype(jnp.bfloat16), ow_ref[...],
                          preferred_element_type=jnp.float32) + ob_ref[...])
        logits_ref[...] = logits

        # numerically-stable softmax (exact divide) shared with the entropy
        m = jnp.max(logits, axis=-1, keepdims=True)
        e = jnp.exp(logits - m)
        s = jnp.sum(e, axis=-1, keepdims=True)
        inv_s = 1.0 / s                                    # exact (correctness)
        p = e * inv_s

        # predictive entropy, simplified:  H = m + log(s) - sum(p * logits)
        # (identical math given sum(p)=1; padded lanes have p == 0 exactly)
        ent = (m + jnp.log(s)) - jnp.sum(p * logits, axis=-1, keepdims=True)
        ent = jnp.maximum(ent, 0.0)

        # stash entropy in a spare padded lane of the probs slab (lane-dense
        # store, no extra output slab)
        lane_ids = jax.lax.broadcasted_iota(jnp.int32, p.shape, 1)
        pe_ref[...] = jnp.where(lane_ids == ent_lane, ent, p)

    return kernel


# ----------------------------------------------------------------------------
# Wrapper: one pallas_call, grid over row tiles, weights as resident blocks
# ----------------------------------------------------------------------------
def run_network(x2d, layer_ws, layer_bs, out_w, out_b, *,
                with_head, ent_lane=None, tile_m=1024):
    M, k0 = x2d.shape
    num_layers = len(layer_ws)
    h_p = layer_ws[-1].shape[1] if num_layers else k0
    o_p = out_w.shape[1]

    # Row tiling: multiple of the sublane width, capped at tile_m.
    m8 = _round_up(max(M, 1), SUBLANE)
    tile_m = min(tile_m, m8)
    m_pad = _round_up(m8, tile_m)
    num_tiles = m_pad // tile_m

    x_p = x2d if m_pad == M else jnp.pad(x2d, ((0, m_pad - M), (0, 0)))

    def resident(arr):
        # constant index map -> weight block stays VMEM-resident across tiles
        return pl.BlockSpec(arr.shape, lambda i: (0, 0))

    in_specs = [pl.BlockSpec((tile_m, k0), lambda i: (i, 0))]
    args = [x_p]
    for w, b in zip(layer_ws, layer_bs):
        in_specs += [resident(w), resident(b)]
        args += [w, b]

    if with_head:
        assert ent_lane is not None and ent_lane < o_p
        in_specs += [resident(out_w), resident(out_b)]
        args += [out_w, out_b]
        out_specs = [
            pl.BlockSpec((tile_m, o_p), lambda i: (i, 0)),   # logits
            pl.BlockSpec((tile_m, o_p), lambda i: (i, 0)),   # probs (+entropy lane)
        ]
        out_shape = [
            jax.ShapeDtypeStruct((m_pad, o_p), jnp.float32),
            jax.ShapeDtypeStruct((m_pad, o_p), jnp.float32),
        ]
    else:
        out_specs = [pl.BlockSpec((tile_m, h_p), lambda i: (i, 0))]
        out_shape = [jax.ShapeDtypeStruct((m_pad, h_p), jnp.float32)]

    # Advisory cost estimate for the XLA scheduler.
    dims = [k0] + [w.shape[1] for w in layer_ws]
    if with_head:
        dims = dims + [o_p]
    flops = sum(2 * m_pad * a * b for a, b in zip(dims[:-1], dims[1:]))
    transcend = m_pad * sum(w.shape[1] for w in layer_ws)            # tanh
    if with_head:
        transcend += m_pad * (o_p + 2)                               # exp, log, rcp
    bytes_in = sum(int(a.size) * a.dtype.itemsize for a in args)
    bytes_out = sum(math.prod(s.shape) * 4 for s in out_shape)

    # Explicit scoped-VMEM budget: activation tile (2x buffered) + resident
    # weights + output tiles (2x buffered), plus headroom.  Keeps v7x
    # (64 MiB physical / 32 MiB default scoped) from silently OOM'ing.
    tile_bytes = tile_m * k0 * 4
    tile_bytes += sum(int(a.size) * a.dtype.itemsize for a in args[1:])
    tile_bytes += sum(tile_m * s.shape[1] * 4 for s in out_shape)
    vmem_limit = int(min(max(4 * tile_bytes, 32 << 20), 96 << 20))

    kernel = _make_network_kernel(num_layers, with_head, ent_lane)

    outs = pl.pallas_call(
        kernel,
        grid=(num_tiles,),
        in_specs=in_specs,
        out_specs=out_specs,
        out_shape=out_shape,
        compiler_params=pltpu.CompilerParams(
            dimension_semantics=("parallel",),
            vmem_limit_bytes=vmem_limit),
        cost_estimate=pl.CostEstimate(
            flops=int(flops),
            transcendentals=int(transcend),
            bytes_accessed=int(bytes_in + bytes_out)),
    )(*args)
    return tuple(outs)


# ----------------------------------------------------------------------------
# Concrete "Module" realization in JAX, using the fused Pallas kernel above
# ----------------------------------------------------------------------------
class PallasModule:
    def __init__(self, num_layers, vocab_size, input_size, hidden_size,
                 output_size, is_sequence_classifier, key, tile_m=1024):
        self.num_layers = num_layers
        self.vocab_size = vocab_size
        self.input_size = input_size
        self.hidden_size = hidden_size
        self.output_size = output_size
        self.is_sequence_classifier = is_sequence_classifier
        self.default_uncertainty_metric = "predictive_entropy"
        # per-generation tunable: 2048 on v5e/v6e (128 MiB VMEM), <=1024 on v7x
        self.tile_m = tile_m

        keys = jax.random.split(key, num_layers + 2)

        def init_w(rng, shape):
            return (jax.random.normal(rng, shape, jnp.float32)
                    * (1.0 / jnp.sqrt(jnp.float32(shape[0]))))

        # ---- unpadded ("logical") parameters -------------------------------
        self.embedding = jax.random.normal(
            keys[0], (vocab_size, input_size), jnp.float32) * 0.1

        self.layer_ws, self.layer_bs = [], []
        in_dim = input_size
        for li in range(num_layers):
            self.layer_ws.append(init_w(keys[1 + li], (in_dim, hidden_size)))
            self.layer_bs.append(jnp.zeros((hidden_size,), jnp.float32))
            in_dim = hidden_size

        self.out_w = init_w(keys[num_layers + 1], (in_dim, output_size))
        self.out_b = jnp.zeros((output_size,), jnp.float32)

        # ---- padded, bf16 (MXU-friendly) kernel-side parameters ------------
        self._h_p = _round_up(hidden_size, LANE)
        # +1 guarantees a spare padded lane to carry the per-row entropy
        self._o_p = _round_up(output_size + 1, LANE)
        self._ent_lane = output_size

        self._layer_ws_p, self._layer_bs_p = [], []
        k_prev = input_size            # first-layer K stays unpadded (matches x)
        for w, b in zip(self.layer_ws, self.layer_bs):
            self._layer_ws_p.append(
                _pad2d(w, k_prev, self._h_p).astype(jnp.bfloat16))
            self._layer_bs_p.append(_pad2d(b.reshape(1, -1), 1, self._h_p))
            k_prev = self._h_p

        self._out_w_p = _pad2d(self.out_w, k_prev, self._o_p).astype(jnp.bfloat16)
        # padded classes get a huge negative f32 bias -> softmax mass exactly 0
        # (kept in f32; -1e30 is also bf16-representable if outputs go bf16)
        ob = jnp.full((1, self._o_p), -1e30, jnp.float32)
        self._out_b_p = ob.at[0, :output_size].set(self.out_b)

        # wrapper-level cache so forward/predict/get_uncertainty reuse one run
        self._cache_key = None
        self._cache = None

    # ---- internal helpers ----------------------------------------------------
    def _run(self, x2d, with_head):
        return run_network(x2d, self._layer_ws_p, self._layer_bs_p,
                           self._out_w_p, self._out_b_p,
                           with_head=with_head, ent_lane=self._ent_lane,
                           tile_m=self.tile_m)

    def _embed_tokens(self, input_ids):
        # TODO(synk): embedding gather left to XLA (jnp.take); no dense Pallas win.
        return jnp.take(self.embedding, input_ids, axis=0)

    def forward_all(self, input_ids):
        """One fused pass -> (logits, probs, predictive_entropy), cached per batch."""
        if self._cache is not None and self._cache_key is input_ids:
            return self._cache
        if self.is_sequence_classifier:
            # per-token MLP + first-token pooling: the sequence representation
            # depends only on the first token's embedding (intended semantics).
            x = self._embed_tokens(input_ids[:, 0])                   # (B, in)
            logits_p, pe_p = self._run(x, with_head=True)
            M = input_ids.shape[0]
            out = (logits_p[:M, :self.output_size],
                   pe_p[:M, :self.output_size],
                   pe_p[:M, self._ent_lane])
        else:
            B, S = input_ids.shape
            x = self._embed_tokens(input_ids).reshape(B * S, self.input_size)
            logits_p, pe_p = self._run(x, with_head=True)
            M = B * S
            out = (logits_p[:M, :self.output_size].reshape(B, S, self.output_size),
                   pe_p[:M, :self.output_size].reshape(B, S, self.output_size),
                   pe_p[:M, self._ent_lane].reshape(B, S))
        self._cache_key = input_ids
        self._cache = out
        return out

    # ---- Module API ----------------------------------------------------------
    def get_hidden_representation(self, input_ids):
        B, S = input_ids.shape
        x = self._embed_tokens(input_ids).reshape(B * S, self.input_size)
        (h_p,) = self._run(x, with_head=False)
        return h_p[:B * S, :self.hidden_size].reshape(B, S, self.hidden_size)

    def get_sequence_representation_from_hidden(self, hidden):
        # first-token pooling (transformer-style)
        return hidden[:, 0, :]

    def get_sequence_representation(self, input_ids):
        return self.get_sequence_representation_from_hidden(
            self.get_hidden_representation(input_ids))

    def get_logits(self, input_ids):
        return self.forward_all(input_ids)[0]

    def forward(self, input_ids):
        return self.get_logits(input_ids)

    def predict(self, input_ids):
        return self.forward_all(input_ids)[1]

    def get_uncertainty(self, input_ids, metric_name=None):
        if metric_name is None:
            metric_name = self.default_uncertainty_metric
        # TODO(synk): other single-prediction metrics (max_prob, dempster_shafer,
        # softmax_gap) are not kernelized; only the default metric is fused.
        assert metric_name == "predictive_entropy"
        return self.forward_all(input_ids)[2]

    def get_num_learnable_parameters(self):
        n = int(self.embedding.size) + int(self.out_w.size) + int(self.out_b.size)
        for w, b in zip(self.layer_ws, self.layer_bs):
            n += int(w.size) + int(b.size)
        return n


# ----------------------------------------------------------------------------
# main
# ----------------------------------------------------------------------------
if __name__ == "__main__":
    key = jax.random.PRNGKey(0)
    k_params, k_data = jax.random.split(key)

    num_layers = 2
    vocab_size = 32
    input_size = 32
    hidden_size = 32
    output_size = 16
    batch, seq = 2, 8

    module = PallasModule(num_layers, vocab_size, input_size, hidden_size,
                          output_size, is_sequence_classifier=False,
                          key=k_params)

    input_ids = jax.random.randint(k_data, (batch, seq), 0, vocab_size,
                                   jnp.int32)

    logits = jax.block_until_ready(module.forward(input_ids))
    probs = jax.block_until_ready(module.predict(input_ids))
    unc = jax.block_until_ready(module.get_uncertainty(input_ids))
    hidden = jax.block_until_ready(module.get_hidden_representation(input_ids))

    # ---- pure-JAX reference check (f32 weights; kernel uses bf16 MXU ops) ----
    def ref_hidden(ids):
        h = jnp.take(module.embedding, ids, axis=0)
        for w, b in zip(module.layer_ws, module.layer_bs):
            h = jnp.tanh(h @ w + b)
        return h

    ref_h = ref_hidden(input_ids)
    ref_l = ref_h @ module.out_w + module.out_b
    ref_p = jax.nn.softmax(ref_l, axis=-1)
    ref_u = -jnp.sum(ref_p * jax.nn.log_softmax(ref_l, axis=-1), axis=-1)

    assert logits.shape == (batch, seq, output_size)
    assert probs.shape == (batch, seq, output_size)
    assert unc.shape == (batch, seq)
    assert hidden.shape == (batch, seq, hidden_size)
    # tolerances account for bf16 MXU operands (f32 accumulation)
    assert jnp.allclose(hidden, ref_h, atol=1e-2, rtol=1e-2), "hidden mismatch"
    assert jnp.allclose(logits, ref_l, atol=1e-2, rtol=1e-2), "logits mismatch"
    assert jnp.allclose(probs, ref_p, atol=5e-3), "softmax mismatch"
    assert jnp.allclose(unc, ref_u, atol=2e-2), "entropy mismatch"
    assert bool(jnp.all(unc >= 0.0)), "negative entropy"
    # probabilities over real classes must sum to ~1 (padded lanes carry 0)
    assert jnp.allclose(jnp.sum(probs, axis=-1), 1.0, atol=1e-3), "prob-sum mismatch"

    # ---- sequence-classifier path (same params, first-token pooling) ---------
    module_sc = PallasModule(num_layers, vocab_size, input_size, hidden_size,
                             output_size, is_sequence_classifier=True,
                             key=k_params)
    logits_sc = jax.block_until_ready(module_sc.forward(input_ids))
    unc_sc = jax.block_until_ready(module_sc.get_uncertainty(input_ids))
    assert logits_sc.shape == (batch, output_size)
    assert unc_sc.shape == (batch,)
    assert jnp.allclose(logits_sc, ref_l[:, 0, :], atol=1e-2, rtol=1e-2), \
        "sequence-classifier logits mismatch"

    print("KERNEL_OK")
</pallas_src>

<mosaic_0001>
module attributes {stable_mosaic.version = 11 : i64} {
  func.func @kernel(%arg0: i32, %arg1: memref<16x32xf32, #tpu.memory_space<vmem>>, %arg2: memref<32x128xbf16, #tpu.memory_space<vmem>>, %arg3: memref<1x128xf32, #tpu.memory_space<vmem>>, %arg4: memref<128x128xbf16, #tpu.memory_space<vmem>>, %arg5: memref<1x128xf32, #tpu.memory_space<vmem>>, %arg6: memref<128x128xbf16, #tpu.memory_space<vmem>>, %arg7: memref<1x128xf32, #tpu.memory_space<vmem>>, %arg8: memref<16x128xf32, #tpu.memory_space<vmem>>, %arg9: memref<16x128xf32, #tpu.memory_space<vmem>>) attributes {dimension_semantics = [#tpu.dimension_semantics<parallel>], iteration_bounds = array<i64: 1>, scalar_prefetch = 0 : i64, scratch_operands = 0 : i64, tpu.core_type = #tpu.core_type<tc>, window_params = [{transform_indices = @transform_0, window_bounds = array<i64: 16, 32>}, {pipeline_mode = #tpu.pipeline_mode<synchronous>, transform_indices = @transform_1, window_bounds = array<i64: 32, 128>}, {pipeline_mode = #tpu.pipeline_mode<synchronous>, transform_indices = @transform_2, window_bounds = array<i64: 1, 128>}, {pipeline_mode = #tpu.pipeline_mode<synchronous>, transform_indices = @transform_3, window_bounds = array<i64: 128, 128>}, {pipeline_mode = #tpu.pipeline_mode<synchronous>, transform_indices = @transform_4, window_bounds = array<i64: 1, 128>}, {pipeline_mode = #tpu.pipeline_mode<synchronous>, transform_indices = @transform_5, window_bounds = array<i64: 128, 128>}, {pipeline_mode = #tpu.pipeline_mode<synchronous>, transform_indices = @transform_6, window_bounds = array<i64: 1, 128>}, {transform_indices = @transform_7, window_bounds = array<i64: 16, 128>}, {transform_indices = @transform_8, window_bounds = array<i64: 16, 128>}]} {
    %c0 = arith.constant 0 : index
    %c0_0 = arith.constant 0 : index
    %0 = vector.load %arg1[%c0, %c0_0] : memref<16x32xf32, #tpu.memory_space<vmem>>, vector<16x32xf32>
    %1 = arith.truncf %0 : vector<16x32xf32> to vector<16x32xbf16>
    %c0_1 = arith.constant 0 : index
    %c0_2 = arith.constant 0 : index
    %2 = vector.load %arg2[%c0_1, %c0_2] : memref<32x128xbf16, #tpu.memory_space<vmem>>, vector<32x128xbf16>
    %cst = arith.constant dense<0.000000e+00> : vector<16x128xf32>
    %3 = tpu.matmul %1, %2, %cst {dimension_numbers = #tpu.dot_dimension_numbers<[1], [0], [0], [1], [0, 0, 1, 1], [], []>} : vector<16x32xbf16>, vector<32x128xbf16>, vector<16x128xf32> -> vector<16x128xf32>
    %c0_3 = arith.constant 0 : index
    %c0_4 = arith.constant 0 : index
    %4 = vector.load %arg3[%c0_3, %c0_4] : memref<1x128xf32, #tpu.memory_space<vmem>>, vector<1x128xf32>
    %5 = vector.broadcast %4 : vector<1x128xf32> to vector<16x128xf32>
    %6 = arith.addf %3, %5 : vector<16x128xf32>
    %7 = math.tanh %6 : vector<16x128xf32>
    %8 = arith.truncf %7 : vector<16x128xf32> to vector<16x128xbf16>
    %c0_5 = arith.constant 0 : index
    %c0_6 = arith.constant 0 : index
    %9 = vector.load %arg4[%c0_5, %c0_6] : memref<128x128xbf16, #tpu.memory_space<vmem>>, vector<128x128xbf16>
    %cst_7 = arith.constant dense<0.000000e+00> : vector<16x128xf32>
    %10 = tpu.matmul %8, %9, %cst_7 {dimension_numbers = #tpu.dot_dimension_numbers<[1], [0], [0], [1], [0, 0, 1, 1], [], []>} : vector<16x128xbf16>, vector<128x128xbf16>, vector<16x128xf32> -> vector<16x128xf32>
    %c0_8 = arith.constant 0 : index
    %c0_9 = arith.constant 0 : index
    %11 = vector.load %arg5[%c0_8, %c0_9] : memref<1x128xf32, #tpu.memory_space<vmem>>, vector<1x128xf32>
    %12 = vector.broadcast %11 : vector<1x128xf32> to vector<16x128xf32>
    %13 = arith.addf %10, %12 : vector<16x128xf32>
    %14 = math.tanh %13 : vector<16x128xf32>
    %15 = arith.truncf %14 : vector<16x128xf32> to vector<16x128xbf16>
    %c0_10 = arith.constant 0 : index
    %c0_11 = arith.constant 0 : index
    %16 = vector.load %arg6[%c0_10, %c0_11] : memref<128x128xbf16, #tpu.memory_space<vmem>>, vector<128x128xbf16>
    %cst_12 = arith.constant dense<0.000000e+00> : vector<16x128xf32>
    %17 = tpu.matmul %15, %16, %cst_12 {dimension_numbers = #tpu.dot_dimension_numbers<[1], [0], [0], [1], [0, 0, 1, 1], [], []>} : vector<16x128xbf16>, vector<128x128xbf16>, vector<16x128xf32> -> vector<16x128xf32>
    %c0_13 = arith.constant 0 : index
    %c0_14 = arith.constant 0 : index
    %18 = vector.load %arg7[%c0_13, %c0_14] : memref<1x128xf32, #tpu.memory_space<vmem>>, vector<1x128xf32>
    %19 = vector.broadcast %18 : vector<1x128xf32> to vector<16x128xf32>
    %20 = arith.addf %17, %19 : vector<16x128xf32>
    %c0_15 = arith.constant 0 : index
    %c0_16 = arith.constant 0 : index
    %21 = vector.load %arg8[%c0_15, %c0_16] : memref<16x128xf32, #tpu.memory_space<vmem>>, vector<16x128xf32>
    tpu.vector_store %arg8[%c0_15, %c0_16], %20 {strides = array<i32>} : memref<16x128xf32, #tpu.memory_space<vmem>>, vector<16x128xf32>,
    %cst_17 = arith.constant dense<0xFF800000> : vector<16xf32>
    %22 = vector.multi_reduction <maximumf>, %20, %cst_17 [1] : vector<16x128xf32> to vector<16xf32>
    %23 = vector.shape_cast %22 : vector<16xf32> to vector<16x1xf32>
    %24 = vector.broadcast %23 : vector<16x1xf32> to vector<16x128xf32>
    %25 = arith.subf %20, %24 : vector<16x128xf32>
    %26 = math.exp %25 : vector<16x128xf32>
    %cst_18 = arith.constant dense<0.000000e+00> : vector<16xf32>
    %27 = vector.multi_reduction <add>, %26, %cst_18 [1] : vector<16x128xf32> to vector<16xf32>
    %28 = vector.shape_cast %27 : vector<16xf32> to vector<16x1xf32>
    %cst_19 = arith.constant 1.000000e+00 : f32
    %29 = vector.broadcast %cst_19 : f32 to vector<16x1xf32>
    %30 = arith.divf %29, %28 : vector<16x1xf32>
    %31 = vector.broadcast %30 : vector<16x1xf32> to vector<16x128xf32>
    %32 = arith.mulf %26, %31 : vector<16x128xf32>
    %33 = math.log %28 : vector<16x1xf32>
    %34 = arith.addf %23, %33 : vector<16x1xf32>
    %35 = arith.mulf %32, %20 : vector<16x128xf32>
    %cst_20 = arith.constant dense<0.000000e+00> : vector<16xf32>
    %36 = vector.multi_reduction <add>, %35, %cst_20 [1] : vector<16x128xf32> to vector<16xf32>
    %37 = vector.shape_cast %36 : vector<16xf32> to vector<16x1xf32>
    %38 = arith.subf %34, %37 : vector<16x1xf32>
    %cst_21 = arith.constant 0.000000e+00 : f32
    %39 = vector.broadcast %cst_21 : f32 to vector<16x1xf32>
    %40 = arith.maximumf %38, %39 : vector<16x1xf32>
    %41 = tpu.iota {dimensions = array<i32: 1>} : vector<16x128xi32>
    %c16_i32 = arith.constant 16 : i32
    %42 = vector.broadcast %c16_i32 : i32 to vector<16x128xi32>
    %43 = arith.cmpi eq, %41, %42 : vector<16x128xi32>
    %44 = vector.shape_cast %40 : vector<16x1xf32> to vector<16x1xf32>
    %45 = vector.broadcast %44 : vector<16x1xf32> to vector<16x128xf32>
    %46 = arith.select %43, %45, %32 : vector<16x128xi1>, vector<16x128xf32>
    %c0_22 = arith.constant 0 : index
    %c0_23 = arith.constant 0 : index
    %47 = vector.load %arg9[%c0_22, %c0_23] : memref<16x128xf32, #tpu.memory_space<vmem>>, vector<16x128xf32>
    tpu.vector_store %arg9[%c0_22, %c0_23], %46 {strides = array<i32>} : memref<16x128xf32, #tpu.memory_space<vmem>>, vector<16x128xf32>,
    return
  }
  func.func @transform_0(%arg0: i32) -> (i32, i32) {
    %c0_i32 = arith.constant 0 : i32
    %c0_i32_0 = arith.constant 0 : i32
    return %arg0, %c0_i32 : i32, i32
  }
  func.func @transform_1(%arg0: i32) -> (i32, i32) {
    %c0_i32 = arith.constant 0 : i32
    %c0_i32_0 = arith.constant 0 : i32
    %c0_i32_1 = arith.constant 0 : i32
    return %c0_i32, %c0_i32_0 : i32, i32
  }
  func.func @transform_2(%arg0: i32) -> (i32, i32) {
    %c0_i32 = arith.constant 0 : i32
    %c0_i32_0 = arith.constant 0 : i32
    %c0_i32_1 = arith.constant 0 : i32
    return %c0_i32, %c0_i32_0 : i32, i32
  }
  func.func @transform_3(%arg0: i32) -> (i32, i32) {
    %c0_i32 = arith.constant 0 : i32
    %c0_i32_0 = arith.constant 0 : i32
    %c0_i32_1 = arith.constant 0 : i32
    return %c0_i32, %c0_i32_0 : i32, i32
  }
  func.func @transform_4(%arg0: i32) -> (i32, i32) {
    %c0_i32 = arith.constant 0 : i32
    %c0_i32_0 = arith.constant 0 : i32
    %c0_i32_1 = arith.constant 0 : i32
    return %c0_i32, %c0_i32_0 : i32, i32
  }
  func.func @transform_5(%arg0: i32) -> (i32, i32) {
    %c0_i32 = arith.constant 0 : i32
    %c0_i32_0 = arith.constant 0 : i32
    %c0_i32_1 = arith.constant 0 : i32
    return %c0_i32, %c0_i32_0 : i32, i32
  }
  func.func @transform_6(%arg0: i32) -> (i32, i32) {
    %c0_i32 = arith.constant 0 : i32
    %c0_i32_0 = arith.constant 0 : i32
    %c0_i32_1 = arith.constant 0 : i32
    return %c0_i32, %c0_i32_0 : i32, i32
  }
  func.func @transform_7(%arg0: i32) -> (i32, i32) {
    %c0_i32 = arith.constant 0 : i32
    %c0_i32_0 = arith.constant 0 : i32
    return %arg0, %c0_i32 : i32, i32
  }
  func.func @transform_8(%arg0: i32) -> (i32, i32) {
    %c0_i32 = arith.constant 0 : i32
    %c0_i32_0 = arith.constant 0 : i32
    return %arg0, %c0_i32 : i32, i32
  }
}

</mosaic_0001>

<bundles_post_ra>
// kernel: tpu_custom_call.1
= control target key start
LH: loop header
LB: loop body
LE: loop exit
PB: predicated region body
PF: predicated region fallthrough
CT: control target
= control target key end

     0   :  { %14 = vsyncpa [#allocation3], 0  ;;  %s788_s0 = inlined_call_operand.hbm [shape: f32[16,32], index: 0, kind: input, shape index: {}]   ;;  %s789_s1 = inlined_call_operand.hbm [shape: bf16[32,128], index: 1, kind: input, shape index: {}]   ;;  %s790_s2 = inlined_call_operand.vmem [shape: f32[1,128], index: 2, kind: input, shape index: {}]   ;;  %s791_s3 = inlined_call_operand.hbm [shape: bf16[128,128], index: 3, kind: input, shape index: {}]   ;;  %s792_s4 = inlined_call_operand.vmem [shape: f32[1,128], index: 4, kind: input, shape index: {}]   ;;  %s793_s5 = inlined_call_operand.hbm [shape: bf16[128,128], index: 5, kind: input, shape index: {}]   ;;  %s794_s6 = inlined_call_operand.vmem [shape: f32[1,128], index: 6, kind: input, shape index: {}]   ;;  %s795_s7 = inlined_call_operand.hbm [shape: f32[16,128], index: 7, kind: output, shape index: {0}]   ;;  %s796_s8 = inlined_call_operand.hbm [shape: f32[16,128], index: 8, kind: output, shape index: {1}]  }
   0x1   :  { %15 = vsyncpa [#allocation6], 0 }
   0x2   :  { %16 = vsyncpa [#allocation9], 0 }
   0x3   :  { %17 = vsyncpa [#allocation4], 0  ;;  %s36_s29 = sshll.u32 %s789_s1, 4  ;;  %s37_s29 = int_to_ptr.hbm [resolvable:$true] %s36_s29 }
   0x4   :  { %18 = vsyncpa [#allocation12], 0  ;;  %s693_s30 = smov [#allocation5]   ;;  %s23_s12 = sshll.u32 %s788_s0, 4  ;;  %s24_s12 = int_to_ptr.hbm [resolvable:$true] %s23_s12 }
   0x5   :  { %s38_s9 = sshll.u32 %s693_s30, 4  ;;  %s694_s13 = smov 64   ;;  %s39_s9 = int_to_ptr.vmem [resolvable:$true] %s38_s9 }
   0x6   :  { %s695_s14 = smov 4   ;;  %s696_s15 = smov [#allocation2]  }
   0x7   :  { %44 = dma.hbm_to_vmem [thread:$0]  %s37_s29, 256, %s39_s9, [#allocation6], %s694_s13, %s694_s13, %s695_s14  }
   0x8   :  { %s25_s16 = sshll.u32 %s696_s15, 4  ;;  %s697_s17 = smov 128   ;;  %s26_s16 = int_to_ptr.vmem [resolvable:$true] %s25_s16 }
   0x9   :  { %s698_s18 = smov 8   ;;  %s51_s20 = sshll.u32 %s791_s3, 4  ;;  %s52_s20 = int_to_ptr.hbm [resolvable:$true] %s51_s20 }
   0xa   :  { %31 = dma.hbm_to_vmem [thread:$0]  %s24_s12, 256, %s26_s16, [#allocation3], %s697_s17, %s697_s17, %s698_s18  }
   0xb   :  { %s699_s21 = smov [#allocation7]   ;;  %s66_s24 = sshll.u32 %s793_s5, 4  ;;  %s67_s24 = int_to_ptr.hbm [resolvable:$true] %s66_s24 }
   0xc   :  { %s53_s0 = sshll.u32 %s699_s21, 4  ;;  %s700_s25 = smov [#allocation8]   ;;  %s54_s0 = int_to_ptr.vmem [resolvable:$true] %s53_s0 }
   0xd   :  { %59 = dma.hbm_to_vmem [thread:$0]  %s52_s20, 1024, %s54_s0, [#allocation6], %s694_s13, %s694_s13, %s695_s14  }
   0xe   :  { %s68_s26 = sshll.u32 %s700_s25, 4  ;;  %s69_s26 = int_to_ptr.vmem [resolvable:$true] %s68_s26 }
   0xf   :  { %74 = dma.hbm_to_vmem [thread:$0]  %s67_s24, 1024, %s69_s26, [#allocation9], %s694_s13, %s694_s13, %s695_s14  }
  0x10   :  { %683 = dma.done.wait [#allocation3], 256  }
  0x11   :  { %684 = vsyncadd [#allocation3], 4294967040 }
  0x12   :  { %685 = dma.done.wait [#allocation6], 1280  }
  0x13   :  { %686 = vsyncadd [#allocation6], 4294966016 }
  0x14   :  { %687 = dma.done.wait [#allocation9], 1024  }
  0x15   :  { %688 = vsyncadd [#allocation9], 4294966272  ;;  %v489_v0 = vld [vmem:[#allocation5 + $0x8] sm:$0xff]  ;;  %v488_v1 = vld [vmem:[#allocation5] sm:$0xff]  ;;  %vm117_vm0 = vcmask 261120   ;;  %s382_s30 = sshll.u32 %s795_s7, 4  ;;  %s383_s30 = int_to_ptr.hbm [resolvable:$true] %s382_s30 }
  0x16   :  { %v497_v2 = vld [vmem:[#allocation7 + $0x38] sm:$0xff]  ;;  %127 = vmatpush.bf16.msra.mxu0 %v489_v0  ;;  %v94_v3 = vld [vmem:[#allocation2] sm:$0xff]  ;;  %v95_v4 = vld [vmem:[#allocation2 + $0x8] sm:$0xff]  ;;  %s701_s9 = smov [#allocation10]   ;;  %s702_s7 = smov [#allocation11]  }
  0x17   :  { %206 = vmatpush.bf16.msra.mxu1 %v497_v2  ;;  %v496_v5 = vld [vmem:[#allocation7 + $0x30] sm:$0xff]  ;;  %v96_v6 = vpack.c.bf16 %v95_v4, %v94_v3  ;;  %v495_v7 = vld [vmem:[#allocation7 + $0x28] sm:$0xff]  ;;  %v494_v8 = vld [vmem:[#allocation7 + $0x20] sm:$0xff]  ;;  %s380_s10 = sshll.u32 %s701_s9, 4  ;;  %s393_s11 = sshll.u32 %s702_s7, 4  ;;  %s381_s10 = int_to_ptr.vmem [resolvable:$true] %s380_s10  ;;  %s394_s11 = int_to_ptr.vmem [resolvable:$true] %s393_s11 }
  0x18   :  { %v493_v9 = vld [vmem:[#allocation7 + $0x18] sm:$0xff]  ;;  %v492_v10 = vld [vmem:[#allocation7 + $0x10] sm:$0xff]  ;;  %v491_v11 = vld [vmem:[#allocation7 + $0x8] sm:$0xff]  ;;  %s395_s14 = sshll.u32 %s796_s8, 4  ;;  %s396_s14 = int_to_ptr.hbm [resolvable:$true] %s395_s14 }
  0x19   :  { %v490_v12 = vld [vmem:[#allocation7] sm:$0xff]  ;;  %v505_v13 = vld [vmem:[#allocation8 + $0x38] sm:$0xff]  ;;  %v504_v14 = vld [vmem:[#allocation8 + $0x30] sm:$0xff] }
  0x1a   :  { %128 = vmatpush.bf16.msra.mxu0 %v488_v1  ;;  %291 = vmatpush.bf16.msra.mxu2 %v505_v13  ;;  %v503_v15 = vld [vmem:[#allocation8 + $0x28] sm:$0xff]  ;;  %v516_v17 = vld [vmem:[%s790_s2] ss:$0 sm:$0xff]  ;;  %v501_v25 = vld [vmem:[#allocation8 + $0x18] sm:$0xff]  ;;  %v369_v13 = vlaneseq }
  0x1b   :  { %207 = vmatpush.bf16.msra.mxu1 %v496_v5  ;;  %v502_v24 = vld [vmem:[#allocation8 + $0x20] sm:$0xff]  ;;  %v500_v26 = vld [vmem:[#allocation8 + $0x10] sm:$0xff]  ;;  %v499_v27 = vld [vmem:[#allocation8 + $0x8] sm:$0xff] }
  0x1c   :  { %v498_v28 = vld [vmem:[#allocation8] sm:$0xff] }
  0x1d   :  { %423 = vmatmul.msk.bf16.vlgmr.msra.gmra.mxu0 %vm117_vm0, %v96_v6  ;;  %v517_v30 = vld [vmem:[%s792_s4] ss:$0 sm:$0xff] }
  0x1e   :  { %292 = vmatpush.bf16.msra.mxu2 %v504_v14  ;;  %v518_v37 = vld [vmem:[%s794_s6] ss:$0 sm:$0xff] }
  0x1f   :  { %208 = vmatpush.bf16.msra.mxu1 %v495_v7 }
  0x22   :  { %293 = vmatpush.bf16.msra.mxu2 %v503_v15  ;;  %v370_v15 = vand.u32 127, %v369_v13 }
  0x23   :  { %209 = vmatpush.bf16.msra.mxu1 %v494_v8 }
  0x24   :  { %vm371_vm9 = vcmp.eq.s32.totalorder %v370_v15, 16 }
  0x26   :  { %294 = vmatpush.bf16.msra.mxu2 %v502_v24 }
  0x27   :  { %210 = vmatpush.bf16.msra.mxu1 %v493_v9 }
  0x2a   :  { %295 = vmatpush.bf16.msra.mxu2 %v501_v25 }
  0x2b   :  { %211 = vmatpush.bf16.msra.mxu1 %v492_v10 }
  0x2e   :  { %296 = vmatpush.bf16.msra.mxu2 %v500_v26 }
  0x2f   :  { %212 = vmatpush.bf16.msra.mxu1 %v491_v11 }
  0x32   :  { %297 = vmatpush.bf16.msra.mxu2 %v499_v27 }
  0x33   :  { %213 = vmatpush.bf16.msra.mxu1 %v490_v12 }
  0x36   :  { %298 = vmatpush.bf16.msra.mxu2 %v498_v28 }
  0x9a   :  { %v130_v16 = vpop.f32.mrf.mxu0 }
  0x9b   :  { %v131_v18 = vadd.f32 %v516_v17, %v130_v16 }
  0x9d   :  { %519 = vtanh.f32 %v131_v18 }
  0xa2   :  { %v132_v19 = vpop.f32.mrf.mxu0 }
  0xa3   :  { %v133_v20 = vadd.f32 %v516_v17, %v132_v19  ;;  %v520_v21 = vpop.eup %519 }
  0xa5   :  { %521 = vtanh.f32 %v133_v20 }
  0xab   :  { %v522_v22 = vpop.eup %521 }
  0xac   :  { %v137_v23 = vpack.c.bf16 %v522_v22, %v520_v21 }
  0xae   :  { %214 = vmatmul.bf16.vlgmr.msra.gmra.mxu1 %v137_v23 }
 0x12b   :  { %v215_v29 = vpop.f32.mrf.mxu1 }
 0x12c   :  { %v216_v31 = vadd.f32 %v517_v30, %v215_v29 }
 0x12e   :  { %523 = vtanh.f32 %v216_v31 }
 0x133   :  { %v217_v32 = vpop.f32.mrf.mxu1 }
 0x134   :  { %v218_v33 = vadd.f32 %v517_v30, %v217_v32  ;;  %v524_v34 = vpop.eup %523 }
 0x136   :  { %525 = vtanh.f32 %v218_v33 }
 0x13c   :  { %v526_v35 = vpop.eup %525 }
 0x13d   :  { %v222_v36 = vpack.c.bf16 %v526_v35, %v524_v34 }
 0x13f   :  { %299 = vmatmul.bf16.vlgmr.msra.gmra.mxu2 %v222_v36 }
 0x1c2   :  { %v300_v38 = vpop.f32.mrf.mxu2 }
 0x1c3   :  { %v301_v39 = vadd.f32 %v518_v37, %v300_v38 }
 0x1c5   :  { %305 = vst [vmem:[#allocation10] sm:$0xff] %v301_v39  ;;  %307 = vmax.xlane.f32.xlu0 %v301_v39 }
 0x1ca   :  { %v302_v40 = vpop.f32.mrf.mxu2 }
 0x1cb   :  { %v303_v41 = vadd.f32 %v518_v37, %v302_v40 }
 0x1cd   :  { %306 = vst [vmem:[#allocation10 + $0x8] sm:$0xff] %v303_v41  ;;  %309 = vmax.xlane.f32.xlu0 %v303_v41 }
 0x1ce   :  { %388 = dma.vmem_to_hbm [thread:$0]  %s381_s10, 256, %s383_s30, [#allocation4], %s697_s17, %s697_s17, %s698_s18  }
 0x238   :  { %v308_v42 = vpop.xlane.xlu0 %307 }
 0x239   :  { %v311_v43 = vsub.f32 %v301_v39, %v308_v42 }
 0x23b   :  { %v313_v44 = vmul.f32 1.442695, %v311_v43 }
 0x23d   :  { %527 = vpow2.f32 %v313_v44 }
 0x240   :  { %v772_v45 = vpop.xlane.xlu0 %309 }
 0x241   :  { %v312_v46 = vsub.f32 %v303_v41, %v772_v45 }
 0x243   :  { %v528_v47 = vpop.eup %527  ;;  %v315_v48 = vmul.f32 1.442695, %v312_v46 }
 0x244   :  { %317 = vadd.xlane.f32.xlu1 %v528_v47 }
 0x245   :  { %529 = vpow2.f32 %v315_v48 }
 0x24b   :  { %v530_v49 = vpop.eup %529 }
 0x24c   :  { %319 = vadd.xlane.f32.xlu1 %v530_v49 }
 0x2b7   :  { %v318_v50 = vpop.xlane.xlu1 %317 }
 0x2b8   :  { %531 = vrcp.f32 %v318_v50  ;;  %v332_v55 = vand.u32 2147483648, %v318_v50  ;;  %v330_v57 = vand.u32 2147483647, %v318_v50  ;;  %vm326_vm2 = vweird.f32 %v318_v50 }
 0x2ba   :  { %v333_v60 = vor.u32 1.1754944e-38, %v332_v55  ;;  %vm331_vm4 = vcmp.eq.f32.partialorder %v330_v57, 8.507059e+37 }
 0x2be   :  { %v532_v51 = vpop.eup %531 }
 0x2bf   :  { %v322_v52 = vmul.f32 %v532_v51, %v318_v50  ;;  %v320_v53 = vpop.xlane.xlu1 %319  ;;  %vm327_vm1 = vweird.f32 %v532_v51 }
 0x2c0   :  { %533 = vrcp.f32 %v320_v53  ;;  %vm328_vm3 = vmor %vm326_vm2, %vm327_vm1  ;;  %v347_v2 = vand.u32 2147483648, %v320_v53  ;;  %v345_v5 = vand.u32 2147483647, %v320_v53  ;;  %vm341_vm6 = vweird.f32 %v320_v53 }
 0x2c1   :  { %v323_v54 = vsub.f32 1.0, %v322_v52  ;;  %535 = vlog2.f32 %v318_v50 }
 0x2c2   :  { %v348_v7 = vor.u32 1.1754944e-38, %v347_v2  ;;  %vm346_vm8 = vcmp.eq.f32.partialorder %v345_v5, 8.507059e+37  ;;  %537 = vlog2.f32 %v320_v53 }
 0x2c3   :  { %v324_v56 = vmul.f32 %v532_v51, %v323_v54 }
 0x2c5   :  { %v325_v58 = vadd.f32 %v532_v51, %v324_v56 }
 0x2c6   :  { %v534_v59 = vpop.eup %533 }
 0x2c7   :  { %v337_v61 = vmul.f32 %v534_v59, %v320_v53  ;;  %v329_v62 = vsel %vm328_vm3, %v532_v51, %v325_v58  ;;  %vm342_vm5 = vweird.f32 %v534_v59  ;;  %v536_v12 = vpop.eup %535 }
 0x2c8   :  { %v334_v63 = vsel %vm331_vm4, %v333_v60, %v329_v62  ;;  %vm343_vm7 = vmor %vm341_vm6, %vm342_vm5  ;;  %v354_v14 = vmul.f32 0.6931472, %v536_v12  ;;  %v538_v17 = vpop.eup %537 }
 0x2c9   :  { %v338_v0 = vsub.f32 1.0, %v337_v61  ;;  %v351_v1 = vmul.f32 %v528_v47, %v334_v63  ;;  %v356_v21 = vmul.f32 0.6931472, %v538_v17 }
 0x2ca   :  { %v357_v16 = vadd.f32 %v354_v14, %v308_v42 }
 0x2cb   :  { %v339_v3 = vmul.f32 %v534_v59, %v338_v0  ;;  %v359_v4 = vmul.f32 %v351_v1, %v301_v39  ;;  %v358_v23 = vadd.f32 %v356_v21, %v772_v45 }
 0x2cd   :  { %361 = vadd.xlane.f32.xlu2 %v359_v4  ;;  %v340_v6 = vadd.f32 %v534_v59, %v339_v3 }
 0x2cf   :  { %v344_v8 = vsel %vm343_vm7, %v534_v59, %v340_v6 }
 0x2d0   :  { %v349_v9 = vsel %vm346_vm8, %v348_v7, %v344_v8 }
 0x2d1   :  { %v352_v10 = vmul.f32 %v530_v49, %v349_v9 }
 0x2d3   :  { %v360_v11 = vmul.f32 %v352_v10, %v303_v41 }
 0x2d5   :  { %363 = vadd.xlane.f32.xlu2 %v360_v11 }
 0x340   :  { %v362_v18 = vpop.xlane.xlu2 %361 }
 0x341   :  { %v365_v19 = vsub.f32 %v357_v16, %v362_v18 }
 0x343   :  { %v367_v20 = vmax.f32 %v365_v19, 0.0 }
 0x345   :  { %v372_v22 = vsel %vm371_vm9, %v367_v20, %v351_v1 }
 0x346   :  { %374 = vst [vmem:[#allocation11] sm:$0xff] %v372_v22 }
 0x348   :  { %v364_v24 = vpop.xlane.xlu2 %363 }
 0x349   :  { %v366_v25 = vsub.f32 %v358_v23, %v364_v24 }
 0x34b   :  { %v368_v26 = vmax.f32 %v366_v25, 0.0 }
 0x34d   :  { %v373_v27 = vsel %vm371_vm9, %v368_v26, %v352_v10 }
 0x34e   :  { %375 = vst [vmem:[#allocation11 + $0x8] sm:$0xff] %v373_v27 }
 0x34f   :  { %401 = dma.vmem_to_hbm [thread:$0]  %s394_s11, 256, %s396_s14, [#allocation12], %s697_s17, %s697_s17, %s698_s18  }
 0x350   :  { %689 = dma.done.wait [#allocation4], 256  }
 0x351   :  { %690 = vsyncadd [#allocation4], 4294967040 }
 0x352   :  { %691 = dma.done.wait [#allocation12], 256  }
 0x353   :  { %692 = vsyncadd [#allocation12], 4294967040 }
 0x354   :  { %410 = vsyncpa [#allocation3], 1 }
 0x355   :  { %411 = vsyncpa [#allocation6], 1 }
 0x356   :  { %412 = vsyncpa [#allocation9], 1 }
 0x357   :  { %413 = vsyncpa [#allocation4], 1 }
 0x358   :  { %414 = vsyncpa [#allocation12], 1 }

</bundles_post_ra>
